<compile_context>
chip_gen: v5e
topology: v5e:2x2
jax: 0.10.0
libtpu: 0.0.40
codegen_flags: <defaults>
</compile_context>

<pallas_src>
import numpy as np
import jax
import jax.numpy as jnp
from jax.experimental import pallas as pl
from jax.experimental.pallas import tpu as pltpu

# ---------------- problem sizes (small, consistent with the module) ----------
INPUT_DIM = 2      # x_input features (Jacobian differentiation dims)
OBS_DIM = 1        # observations features
HIDDEN = 256       # hidden_num
OUTPUT_DIM = 2     # output_dim
CAT_DIM = INPUT_DIM + OBS_DIM + 1   # concat([x, obs, t])
BATCH = 8
PACKED_OUT = OUTPUT_DIM * (1 + INPUT_DIM)   # [out | J_:,:,0 | J_:,:,1]


def _pick_tb(batch):
    """Batch tile: MXU-height matched for large batches, 8 otherwise."""
    if batch >= 256:
        return 256       # 3*TB = 768 = 3x256 (v6e/v7x MXU height)
    if batch >= 128:
        return 128       # 3*TB = 384 = 3x128 (v5e MXU height)
    return 8


def _make_kernel(tb):
    """Kernel factory; `tb` (batch tile) is baked in statically."""

    def kernel(x_ref, obs_ref, t_ref,
               w1_ref, b1_ref, w2_ref, b2_ref,
               w3_ref, b3_ref, w4_ref, b4_ref, out_ref):
        f32 = jnp.float32
        bf16 = jnp.bfloat16

        x = x_ref[...]            # (tb, INPUT_DIM) f32
        obs = obs_ref[...]        # (tb, OBS_DIM)   f32
        t = t_ref[...]            # (tb, 1)         f32

        w1 = w1_ref[...]          # (CAT_DIM, H) f32 (tiny; full precision)
        w2 = w2_ref[...]          # (H, H) bf16
        w3 = w3_ref[...]          # (H, H) bf16
        w4 = w4_ref[...]          # (H, O) bf16, 0.5 folded
        b1 = b1_ref[...]          # (1, H) f32
        b2 = b2_ref[...]
        b3 = b3_ref[...]
        b4 = b4_ref[...]          # (1, O) f32, 0.5 folded

        # ---- layer 1: contraction dim is only CAT_DIM=4, so compute it as
        # VPU broadcast multiply-adds (no padded MXU push, no concat needed).
        z1 = x[:, 0:1] * w1[0:1, :]
        for d in range(1, INPUT_DIM):
            z1 = z1 + x[:, d:d + 1] * w1[d:d + 1, :]
        for d in range(OBS_DIM):
            r = INPUT_DIM + d
            z1 = z1 + obs[:, d:d + 1] * w1[r:r + 1, :]
        z1 = z1 + t[:, 0:1] * w1[CAT_DIM - 1:CAT_DIM, :]
        z1 = z1 + b1
        h1 = jnp.tanh(z1)                    # (tb, H)
        g1 = 1.0 - h1 * h1                   # tanh'(z) = 1 - tanh(z)^2
        # Jacobian tangent seeds wrt x[:, d] are just rows of W1.
        u1_0 = g1 * w1[0:1, :]               # (tb, H) tangent wrt x[:, 0]
        u1_1 = g1 * w1[1:2, :]               # (tb, H) tangent wrt x[:, 1]

        # ---- layers 2..4: one stacked (3*tb, H) MXU matmul per layer;
        # rows [0:tb]=forward, [tb:2tb]=tangent d0, [2tb:3tb]=tangent d1.
        l1 = jnp.concatenate([h1, u1_0, u1_1], axis=0).astype(bf16)
        z2 = jnp.dot(l1, w2, preferred_element_type=f32)
        h2 = jnp.tanh(z2[0:tb, :] + b2)
        g2 = 1.0 - h2 * h2
        u2_0 = g2 * z2[tb:2 * tb, :]
        u2_1 = g2 * z2[2 * tb:3 * tb, :]

        l2 = jnp.concatenate([h2, u2_0, u2_1], axis=0).astype(bf16)
        z3 = jnp.dot(l2, w3, preferred_element_type=f32)
        h3 = jnp.tanh(z3[0:tb, :] + b3)
        g3 = 1.0 - h3 * h3
        u3_0 = g3 * z3[tb:2 * tb, :]
        u3_1 = g3 * z3[2 * tb:3 * tb, :]

        l3 = jnp.concatenate([h3, u3_0, u3_1], axis=0).astype(bf16)
        z4 = jnp.dot(l3, w4, preferred_element_type=f32)      # (3*tb, O)
        out = z4[0:tb, :] + b4                                 # (tb, O)
        j0 = z4[tb:2 * tb, :]                                  # dout/dx0
        j1 = z4[2 * tb:3 * tb, :]                              # dout/dx1

        # single lane-contiguous packed store: [out | J_d0 | J_d1]
        out_ref[...] = jnp.concatenate([out, j0, j1], axis=1).astype(out_ref.dtype)

    return kernel


def prepare_kernel_params(params):
    """One-time conversion of f32 master params into kernel-ready params.

    Hoisted out of the hot path: bf16 copies of W2/W3/W4 and the 0.5 output
    fold are created ONCE here.  W1 stays f32 (4 KiB; layer-1 / seed precision).
    """
    w1, b1, w2, b2, w3, b3, w4, b4 = params
    bf16 = jnp.bfloat16
    return (w1, b1,
            w2.astype(bf16), b2,
            w3.astype(bf16), b3,
            (w4 * 0.5).astype(bf16), b4 * 0.5)


def mlp_w_jac_forward(x_input, observations, t, kernel_params, *, tb=None):
    """Returns (output (B, O), jacobian (B, O, D)) matching the PyTorch module.

    `kernel_params` must come from prepare_kernel_params(...) (called once).
    """
    w1, b1, w2, b2, w3, b3, w4, b4 = kernel_params
    B = x_input.shape[0]
    if tb is None:
        tb = _pick_tb(B)
    grid = pl.cdiv(B, tb)
    b_pad = grid * tb
    if b_pad != B:                      # tail-safe: zero-pad, slice afterwards
        pad = ((0, b_pad - B), (0, 0))
        x_input = jnp.pad(x_input, pad)
        observations = jnp.pad(observations, pad)
        t = jnp.pad(t, pad)

    wspec = lambda shape: pl.BlockSpec(shape, lambda i: (0,) * len(shape))

    packed = pl.pallas_call(
        _make_kernel(tb),
        out_shape=jax.ShapeDtypeStruct((b_pad, PACKED_OUT), jnp.float32),
        grid_spec=pltpu.PrefetchScalarGridSpec(
            num_scalar_prefetch=0,
            grid=(grid,),
            in_specs=[
                pl.BlockSpec((tb, INPUT_DIM), lambda i: (i, 0)),   # x_input
                pl.BlockSpec((tb, OBS_DIM), lambda i: (i, 0)),     # observations
                pl.BlockSpec((tb, 1), lambda i: (i, 0)),           # t
                wspec((CAT_DIM, HIDDEN)),                          # W1 (f32)
                wspec((1, HIDDEN)),                                # b1
                wspec((HIDDEN, HIDDEN)),                           # W2 (bf16)
                wspec((1, HIDDEN)),                                # b2
                wspec((HIDDEN, HIDDEN)),                           # W3 (bf16)
                wspec((1, HIDDEN)),                                # b3
                wspec((HIDDEN, OUTPUT_DIM)),                       # W4*0.5 (bf16)
                wspec((1, OUTPUT_DIM)),                            # b4*0.5
            ],
            out_specs=pl.BlockSpec((tb, PACKED_OUT), lambda i: (i, 0)),
        ),
        compiler_params=pltpu.CompilerParams(
            dimension_semantics=("parallel",)),
    )(x_input, observations, t, w1, b1, w2, b2, w3, b3, w4, b4)

    packed = packed[:B]
    out = packed[:, :OUTPUT_DIM]
    # packed[:, O + d*O + o] = J[b, o, d]  ->  (B, D, O)  ->  (B, O, D)
    jac = packed[:, OUTPUT_DIM:].reshape(B, INPUT_DIM, OUTPUT_DIM).transpose(0, 2, 1)
    return out, jac


def init_params(key):
    """Deterministic PyTorch-style (uniform ±1/sqrt(fan_in)) init; weights stored (in, out)."""
    def linear(k, fan_in, fan_out):
        k1, k2 = jax.random.split(k)
        bound = 1.0 / np.sqrt(fan_in)
        w = jax.random.uniform(k1, (fan_in, fan_out), jnp.float32, -bound, bound)
        b = jax.random.uniform(k2, (1, fan_out), jnp.float32, -bound, bound)
        return w, b

    k1, k2, k3, k4 = jax.random.split(key, 4)
    w1, b1 = linear(k1, CAT_DIM, HIDDEN)
    w2, b2 = linear(k2, HIDDEN, HIDDEN)
    w3, b3 = linear(k3, HIDDEN, HIDDEN)
    w4, b4 = linear(k4, HIDDEN, OUTPUT_DIM)
    return (w1, b1, w2, b2, w3, b3, w4, b4)


def reference_forward(x_input, observations, t, params):
    """Pure-JAX f32 reference (forward + jacrev-equivalent Jacobian) for validation."""
    w1, b1, w2, b2, w3, b3, w4, b4 = params

    def single(x, o, tt):
        inp = jnp.concatenate([x, o, tt], axis=0)
        h1 = jnp.tanh(inp @ w1 + b1[0])
        h2 = jnp.tanh(h1 @ w2 + b2[0])
        h3 = jnp.tanh(h2 @ w3 + b3[0])
        return (h3 @ w4 + b4[0]) * 0.5

    out = jax.vmap(single)(x_input, observations, t)
    jac = jax.vmap(jax.jacrev(single, argnums=0))(x_input, observations, t)
    return out, jac


if __name__ == "__main__":
    key = jax.random.PRNGKey(0)
    kp, kx, ko, kt = jax.random.split(key, 4)
    params = init_params(kp)
    kparams = prepare_kernel_params(params)   # once, outside the hot path

    x_input = jax.random.normal(kx, (BATCH, INPUT_DIM), jnp.float32)
    observations = jax.random.normal(ko, (BATCH, OBS_DIM), jnp.float32)
    t = jax.random.uniform(kt, (BATCH, 1), jnp.float32)

    out, jac = mlp_w_jac_forward(x_input, observations, t, kparams)
    out, jac = jax.block_until_ready((out, jac))

    ref_out, ref_jac = reference_forward(x_input, observations, t, params)
    # Tolerances account for bf16 MXU inputs (f32 accumulation) in layers 2-4.
    np.testing.assert_allclose(np.asarray(out), np.asarray(ref_out), rtol=3e-2, atol=3e-3)
    np.testing.assert_allclose(np.asarray(jac), np.asarray(ref_jac), rtol=3e-2, atol=3e-3)

    # Tail-padding path: batch not a multiple of the tile (13 -> padded to 16).
    x2 = jax.random.normal(kx, (13, INPUT_DIM), jnp.float32)
    o2 = jax.random.normal(ko, (13, OBS_DIM), jnp.float32)
    t2 = jax.random.uniform(kt, (13, 1), jnp.float32)
    out2, jac2 = jax.block_until_ready(mlp_w_jac_forward(x2, o2, t2, kparams))
    ref_out2, ref_jac2 = reference_forward(x2, o2, t2, params)
    np.testing.assert_allclose(np.asarray(out2), np.asarray(ref_out2), rtol=3e-2, atol=3e-3)
    np.testing.assert_allclose(np.asarray(jac2), np.asarray(ref_jac2), rtol=3e-2, atol=3e-3)

    print("KERNEL_OK")
</pallas_src>

<mosaic_0001>
module attributes {stable_mosaic.version = 11 : i64} {
  func.func @kernel(%arg0: i32, %arg1: memref<8x2xf32, #tpu.memory_space<vmem>>, %arg2: memref<8x1xf32, #tpu.memory_space<vmem>>, %arg3: memref<8x1xf32, #tpu.memory_space<vmem>>, %arg4: memref<4x256xf32, #tpu.memory_space<vmem>>, %arg5: memref<1x256xf32, #tpu.memory_space<vmem>>, %arg6: memref<256x256xbf16, #tpu.memory_space<vmem>>, %arg7: memref<1x256xf32, #tpu.memory_space<vmem>>, %arg8: memref<256x256xbf16, #tpu.memory_space<vmem>>, %arg9: memref<1x256xf32, #tpu.memory_space<vmem>>, %arg10: memref<256x2xbf16, #tpu.memory_space<vmem>>, %arg11: memref<1x2xf32, #tpu.memory_space<vmem>>, %arg12: memref<8x6xf32, #tpu.memory_space<vmem>>) attributes {dimension_semantics = [#tpu.dimension_semantics<parallel>], iteration_bounds = array<i64: 1>, scalar_prefetch = 0 : i64, scratch_operands = 0 : i64, tpu.core_type = #tpu.core_type<tc>, window_params = [{transform_indices = @transform_0, window_bounds = array<i64: 8, 2>}, {transform_indices = @transform_1, window_bounds = array<i64: 8, 1>}, {transform_indices = @transform_2, window_bounds = array<i64: 8, 1>}, {pipeline_mode = #tpu.pipeline_mode<synchronous>, transform_indices = @transform_3, window_bounds = array<i64: 4, 256>}, {pipeline_mode = #tpu.pipeline_mode<synchronous>, transform_indices = @transform_4, window_bounds = array<i64: 1, 256>}, {pipeline_mode = #tpu.pipeline_mode<synchronous>, transform_indices = @transform_5, window_bounds = array<i64: 256, 256>}, {pipeline_mode = #tpu.pipeline_mode<synchronous>, transform_indices = @transform_6, window_bounds = array<i64: 1, 256>}, {pipeline_mode = #tpu.pipeline_mode<synchronous>, transform_indices = @transform_7, window_bounds = array<i64: 256, 256>}, {pipeline_mode = #tpu.pipeline_mode<synchronous>, transform_indices = @transform_8, window_bounds = array<i64: 1, 256>}, {pipeline_mode = #tpu.pipeline_mode<synchronous>, transform_indices = @transform_9, window_bounds = array<i64: 256, 2>}, {pipeline_mode = #tpu.pipeline_mode<synchronous>, transform_indices = @transform_10, window_bounds = array<i64: 1, 2>}, {transform_indices = @transform_11, window_bounds = array<i64: 8, 6>}]} {
    %c0 = arith.constant 0 : index
    %c0_0 = arith.constant 0 : index
    %0 = vector.load %arg1[%c0, %c0_0] : memref<8x2xf32, #tpu.memory_space<vmem>>, vector<8x2xf32>
    %c0_1 = arith.constant 0 : index
    %c0_2 = arith.constant 0 : index
    %1 = vector.load %arg2[%c0_1, %c0_2] : memref<8x1xf32, #tpu.memory_space<vmem>>, vector<8x1xf32>
    %c0_3 = arith.constant 0 : index
    %c0_4 = arith.constant 0 : index
    %2 = vector.load %arg3[%c0_3, %c0_4] : memref<8x1xf32, #tpu.memory_space<vmem>>, vector<8x1xf32>
    %c0_5 = arith.constant 0 : index
    %c0_6 = arith.constant 0 : index
    %3 = vector.load %arg4[%c0_5, %c0_6] : memref<4x256xf32, #tpu.memory_space<vmem>>, vector<4x256xf32>
    %c0_7 = arith.constant 0 : index
    %c0_8 = arith.constant 0 : index
    %4 = vector.load %arg6[%c0_7, %c0_8] : memref<256x256xbf16, #tpu.memory_space<vmem>>, vector<256x256xbf16>
    %c0_9 = arith.constant 0 : index
    %c0_10 = arith.constant 0 : index
    %5 = vector.load %arg8[%c0_9, %c0_10] : memref<256x256xbf16, #tpu.memory_space<vmem>>, vector<256x256xbf16>
    %c0_11 = arith.constant 0 : index
    %c0_12 = arith.constant 0 : index
    %6 = vector.load %arg10[%c0_11, %c0_12] : memref<256x2xbf16, #tpu.memory_space<vmem>>, vector<256x2xbf16>
    %c0_13 = arith.constant 0 : index
    %c0_14 = arith.constant 0 : index
    %7 = vector.load %arg5[%c0_13, %c0_14] : memref<1x256xf32, #tpu.memory_space<vmem>>, vector<1x256xf32>
    %c0_15 = arith.constant 0 : index
    %c0_16 = arith.constant 0 : index
    %8 = vector.load %arg7[%c0_15, %c0_16] : memref<1x256xf32, #tpu.memory_space<vmem>>, vector<1x256xf32>
    %c0_17 = arith.constant 0 : index
    %c0_18 = arith.constant 0 : index
    %9 = vector.load %arg9[%c0_17, %c0_18] : memref<1x256xf32, #tpu.memory_space<vmem>>, vector<1x256xf32>
    %c0_19 = arith.constant 0 : index
    %c0_20 = arith.constant 0 : index
    %10 = vector.load %arg11[%c0_19, %c0_20] : memref<1x2xf32, #tpu.memory_space<vmem>>, vector<1x2xf32>
    %11 = vector.extract_strided_slice %0 {offsets = [0, 0], sizes = [8, 1], strides = [1, 1]} : vector<8x2xf32> to vector<8x1xf32>
    %12 = vector.extract_strided_slice %3 {offsets = [0, 0], sizes = [1, 256], strides = [1, 1]} : vector<4x256xf32> to vector<1x256xf32>
    %13 = vector.broadcast %11 : vector<8x1xf32> to vector<8x256xf32>
    %14 = vector.broadcast %12 : vector<1x256xf32> to vector<8x256xf32>
    %15 = arith.mulf %13, %14 : vector<8x256xf32>
    %16 = vector.extract_strided_slice %0 {offsets = [0, 1], sizes = [8, 1], strides = [1, 1]} : vector<8x2xf32> to vector<8x1xf32>
    %17 = vector.extract_strided_slice %3 {offsets = [1, 0], sizes = [1, 256], strides = [1, 1]} : vector<4x256xf32> to vector<1x256xf32>
    %18 = vector.broadcast %16 : vector<8x1xf32> to vector<8x256xf32>
    %19 = vector.broadcast %17 : vector<1x256xf32> to vector<8x256xf32>
    %20 = arith.mulf %18, %19 : vector<8x256xf32>
    %21 = arith.addf %15, %20 : vector<8x256xf32>
    %22 = vector.extract_strided_slice %3 {offsets = [2, 0], sizes = [1, 256], strides = [1, 1]} : vector<4x256xf32> to vector<1x256xf32>
    %23 = vector.broadcast %1 : vector<8x1xf32> to vector<8x256xf32>
    %24 = vector.broadcast %22 : vector<1x256xf32> to vector<8x256xf32>
    %25 = arith.mulf %23, %24 : vector<8x256xf32>
    %26 = arith.addf %21, %25 : vector<8x256xf32>
    %27 = vector.extract_strided_slice %3 {offsets = [3, 0], sizes = [1, 256], strides = [1, 1]} : vector<4x256xf32> to vector<1x256xf32>
    %28 = vector.broadcast %2 : vector<8x1xf32> to vector<8x256xf32>
    %29 = vector.broadcast %27 : vector<1x256xf32> to vector<8x256xf32>
    %30 = arith.mulf %28, %29 : vector<8x256xf32>
    %31 = arith.addf %26, %30 : vector<8x256xf32>
    %32 = vector.broadcast %7 : vector<1x256xf32> to vector<8x256xf32>
    %33 = arith.addf %31, %32 : vector<8x256xf32>
    %34 = math.tanh %33 : vector<8x256xf32>
    %35 = arith.mulf %34, %34 : vector<8x256xf32>
    %cst = arith.constant 1.000000e+00 : f32
    %36 = vector.broadcast %cst : f32 to vector<8x256xf32>
    %37 = arith.subf %36, %35 : vector<8x256xf32>
    %38 = vector.extract_strided_slice %3 {offsets = [0, 0], sizes = [1, 256], strides = [1, 1]} : vector<4x256xf32> to vector<1x256xf32>
    %39 = vector.broadcast %38 : vector<1x256xf32> to vector<8x256xf32>
    %40 = arith.mulf %37, %39 : vector<8x256xf32>
    %41 = vector.extract_strided_slice %3 {offsets = [1, 0], sizes = [1, 256], strides = [1, 1]} : vector<4x256xf32> to vector<1x256xf32>
    %42 = vector.broadcast %41 : vector<1x256xf32> to vector<8x256xf32>
    %43 = arith.mulf %37, %42 : vector<8x256xf32>
    %44 = tpu.concatenate %34, %40, %43 in 0 : vector<8x256xf32>, vector<8x256xf32>, vector<8x256xf32> -> vector<24x256xf32>
    %45 = arith.truncf %44 : vector<24x256xf32> to vector<24x256xbf16>
    %cst_21 = arith.constant dense<0.000000e+00> : vector<24x256xf32>
    %46 = tpu.matmul %45, %4, %cst_21 {dimension_numbers = #tpu.dot_dimension_numbers<[1], [0], [0], [1], [0, 0, 1, 1], [], []>} : vector<24x256xbf16>, vector<256x256xbf16>, vector<24x256xf32> -> vector<24x256xf32>
    %47 = vector.extract_strided_slice %46 {offsets = [0, 0], sizes = [8, 256], strides = [1, 1]} : vector<24x256xf32> to vector<8x256xf32>
    %48 = vector.broadcast %8 : vector<1x256xf32> to vector<8x256xf32>
    %49 = arith.addf %47, %48 : vector<8x256xf32>
    %50 = math.tanh %49 : vector<8x256xf32>
    %51 = arith.mulf %50, %50 : vector<8x256xf32>
    %cst_22 = arith.constant 1.000000e+00 : f32
    %52 = vector.broadcast %cst_22 : f32 to vector<8x256xf32>
    %53 = arith.subf %52, %51 : vector<8x256xf32>
    %54 = vector.extract_strided_slice %46 {offsets = [8, 0], sizes = [8, 256], strides = [1, 1]} : vector<24x256xf32> to vector<8x256xf32>
    %55 = arith.mulf %53, %54 : vector<8x256xf32>
    %56 = vector.extract_strided_slice %46 {offsets = [16, 0], sizes = [8, 256], strides = [1, 1]} : vector<24x256xf32> to vector<8x256xf32>
    %57 = arith.mulf %53, %56 : vector<8x256xf32>
    %58 = tpu.concatenate %50, %55, %57 in 0 : vector<8x256xf32>, vector<8x256xf32>, vector<8x256xf32> -> vector<24x256xf32>
    %59 = arith.truncf %58 : vector<24x256xf32> to vector<24x256xbf16>
    %cst_23 = arith.constant dense<0.000000e+00> : vector<24x256xf32>
    %60 = tpu.matmul %59, %5, %cst_23 {dimension_numbers = #tpu.dot_dimension_numbers<[1], [0], [0], [1], [0, 0, 1, 1], [], []>} : vector<24x256xbf16>, vector<256x256xbf16>, vector<24x256xf32> -> vector<24x256xf32>
    %61 = vector.extract_strided_slice %60 {offsets = [0, 0], sizes = [8, 256], strides = [1, 1]} : vector<24x256xf32> to vector<8x256xf32>
    %62 = vector.broadcast %9 : vector<1x256xf32> to vector<8x256xf32>
    %63 = arith.addf %61, %62 : vector<8x256xf32>
    %64 = math.tanh %63 : vector<8x256xf32>
    %65 = arith.mulf %64, %64 : vector<8x256xf32>
    %cst_24 = arith.constant 1.000000e+00 : f32
    %66 = vector.broadcast %cst_24 : f32 to vector<8x256xf32>
    %67 = arith.subf %66, %65 : vector<8x256xf32>
    %68 = vector.extract_strided_slice %60 {offsets = [8, 0], sizes = [8, 256], strides = [1, 1]} : vector<24x256xf32> to vector<8x256xf32>
    %69 = arith.mulf %67, %68 : vector<8x256xf32>
    %70 = vector.extract_strided_slice %60 {offsets = [16, 0], sizes = [8, 256], strides = [1, 1]} : vector<24x256xf32> to vector<8x256xf32>
    %71 = arith.mulf %67, %70 : vector<8x256xf32>
    %72 = tpu.concatenate %64, %69, %71 in 0 : vector<8x256xf32>, vector<8x256xf32>, vector<8x256xf32> -> vector<24x256xf32>
    %73 = arith.truncf %72 : vector<24x256xf32> to vector<24x256xbf16>
    %cst_25 = arith.constant dense<0.000000e+00> : vector<24x2xf32>
    %74 = tpu.matmul %73, %6, %cst_25 {dimension_numbers = #tpu.dot_dimension_numbers<[1], [0], [0], [1], [0, 0, 1, 1], [], []>} : vector<24x256xbf16>, vector<256x2xbf16>, vector<24x2xf32> -> vector<24x2xf32>
    %75 = vector.extract_strided_slice %74 {offsets = [0, 0], sizes = [8, 2], strides = [1, 1]} : vector<24x2xf32> to vector<8x2xf32>
    %76 = vector.broadcast %10 : vector<1x2xf32> to vector<8x2xf32>
    %77 = arith.addf %75, %76 : vector<8x2xf32>
    %78 = vector.extract_strided_slice %74 {offsets = [8, 0], sizes = [8, 2], strides = [1, 1]} : vector<24x2xf32> to vector<8x2xf32>
    %79 = vector.extract_strided_slice %74 {offsets = [16, 0], sizes = [8, 2], strides = [1, 1]} : vector<24x2xf32> to vector<8x2xf32>
    %80 = tpu.concatenate %77, %78, %79 in 1 : vector<8x2xf32>, vector<8x2xf32>, vector<8x2xf32> -> vector<8x6xf32>
    %c0_26 = arith.constant 0 : index
    %c0_27 = arith.constant 0 : index
    %81 = vector.load %arg12[%c0_26, %c0_27] : memref<8x6xf32, #tpu.memory_space<vmem>>, vector<8x6xf32>
    tpu.vector_store %arg12[%c0_26, %c0_27], %80 {strides = array<i32>} : memref<8x6xf32, #tpu.memory_space<vmem>>, vector<8x6xf32>,
    return
  }
  func.func @transform_0(%arg0: i32) -> (i32, i32) {
    %c0_i32 = arith.constant 0 : i32
    %c0_i32_0 = arith.constant 0 : i32
    return %arg0, %c0_i32 : i32, i32
  }
  func.func @transform_1(%arg0: i32) -> (i32, i32) {
    %c0_i32 = arith.constant 0 : i32
    %c0_i32_0 = arith.constant 0 : i32
    return %arg0, %c0_i32 : i32, i32
  }
  func.func @transform_2(%arg0: i32) -> (i32, i32) {
    %c0_i32 = arith.constant 0 : i32
    %c0_i32_0 = arith.constant 0 : i32
    return %arg0, %c0_i32 : i32, i32
  }
  func.func @transform_3(%arg0: i32) -> (i32, i32) {
    %c0_i32 = arith.constant 0 : i32
    %c0_i32_0 = arith.constant 0 : i32
    %c0_i32_1 = arith.constant 0 : i32
    return %c0_i32, %c0_i32_0 : i32, i32
  }
  func.func @transform_4(%arg0: i32) -> (i32, i32) {
    %c0_i32 = arith.constant 0 : i32
    %c0_i32_0 = arith.constant 0 : i32
    %c0_i32_1 = arith.constant 0 : i32
    return %c0_i32, %c0_i32_0 : i32, i32
  }
  func.func @transform_5(%arg0: i32) -> (i32, i32) {
    %c0_i32 = arith.constant 0 : i32
    %c0_i32_0 = arith.constant 0 : i32
    %c0_i32_1 = arith.constant 0 : i32
    return %c0_i32, %c0_i32_0 : i32, i32
  }
  func.func @transform_6(%arg0: i32) -> (i32, i32) {
    %c0_i32 = arith.constant 0 : i32
    %c0_i32_0 = arith.constant 0 : i32
    %c0_i32_1 = arith.constant 0 : i32
    return %c0_i32, %c0_i32_0 : i32, i32
  }
  func.func @transform_7(%arg0: i32) -> (i32, i32) {
    %c0_i32 = arith.constant 0 : i32
    %c0_i32_0 = arith.constant 0 : i32
    %c0_i32_1 = arith.constant 0 : i32
    return %c0_i32, %c0_i32_0 : i32, i32
  }
  func.func @transform_8(%arg0: i32) -> (i32, i32) {
    %c0_i32 = arith.constant 0 : i32
    %c0_i32_0 = arith.constant 0 : i32
    %c0_i32_1 = arith.constant 0 : i32
    return %c0_i32, %c0_i32_0 : i32, i32
  }
  func.func @transform_9(%arg0: i32) -> (i32, i32) {
    %c0_i32 = arith.constant 0 : i32
    %c0_i32_0 = arith.constant 0 : i32
    %c0_i32_1 = arith.constant 0 : i32
    return %c0_i32, %c0_i32_0 : i32, i32
  }
  func.func @transform_10(%arg0: i32) -> (i32, i32) {
    %c0_i32 = arith.constant 0 : i32
    %c0_i32_0 = arith.constant 0 : i32
    %c0_i32_1 = arith.constant 0 : i32
    return %c0_i32, %c0_i32_0 : i32, i32
  }
  func.func @transform_11(%arg0: i32) -> (i32, i32) {
    %c0_i32 = arith.constant 0 : i32
    %c0_i32_0 = arith.constant 0 : i32
    return %arg0, %c0_i32 : i32, i32
  }
}

</mosaic_0001>

<bundles_post_ra>
// kernel: tpu_custom_call.1
= control target key start
LH: loop header
LB: loop body
LE: loop exit
PB: predicated region body
PF: predicated region fallthrough
CT: control target
= control target key end

     0   :  { %16 = vsyncpa [#allocation3], 0  ;;  %s1614_s0 = inlined_call_operand.vmem [shape: f32[8,2], index: 0, kind: input, shape index: {}]   ;;  %s1615_s1 = inlined_call_operand.vmem [shape: f32[8,1], index: 1, kind: input, shape index: {}]   ;;  %s1616_s2 = inlined_call_operand.vmem [shape: f32[8,1], index: 2, kind: input, shape index: {}]   ;;  %s1617_s3 = inlined_call_operand.vmem [shape: f32[4,256], index: 3, kind: input, shape index: {}]   ;;  %s1618_s4 = inlined_call_operand.vmem [shape: f32[1,256], index: 4, kind: input, shape index: {}]   ;;  %s1619_s5 = inlined_call_operand.hbm [shape: bf16[256,256], index: 5, kind: input, shape index: {}]   ;;  %s1620_s6 = inlined_call_operand.vmem [shape: f32[1,256], index: 6, kind: input, shape index: {}]   ;;  %s1621_s7 = inlined_call_operand.hbm [shape: bf16[256,256], index: 7, kind: input, shape index: {}]   ;;  %s1622_s8 = inlined_call_operand.vmem [shape: f32[1,256], index: 8, kind: input, shape index: {}]   ;;  %s1623_s9 = inlined_call_operand.vmem [shape: bf16[256,2], index: 9, kind: input, shape index: {}]   ;;  %s1624_s10 = inlined_call_operand.vmem [shape: f32[1,2], index: 10, kind: input, shape index: {}]   ;;  %s1625_s11 = inlined_call_operand.hbm [shape: f32[8,6], index: 11, kind: output, shape index: {}]  }
   0x1   :  { %17 = vsyncpa [#allocation6], 0 }
   0x2   :  { %18 = vsyncpa [#allocation4], 0  ;;  %s33_s19 = sshll.u32 %s1619_s5, 4  ;;  %s1448_s20 = smov [#allocation2]   ;;  %s34_s19 = int_to_ptr.hbm [resolvable:$true] %s33_s19 }
   0x3   :  { %s35_s21 = sshll.u32 %s1448_s20, 4  ;;  %s48_s24 = sshll.u32 %s1621_s7, 4  ;;  %s36_s21 = int_to_ptr.vmem [resolvable:$true] %s35_s21  ;;  %s49_s24 = int_to_ptr.hbm [resolvable:$true] %s48_s24 }
   0x4   :  { %s1449_s25 = smov 128   ;;  %s1450_s26 = smov 8  }
   0x5   :  { %41 = dma.hbm_to_vmem [thread:$0]  %s34_s19, 4096, %s36_s21, [#allocation3], %s1449_s25, %s1449_s25, %s1450_s26  }
   0x6   :  { %s1451_s27 = smov [#allocation5]  }
   0x7   :  { %s50_s28 = sshll.u32 %s1451_s27, 4  ;;  %s51_s28 = int_to_ptr.vmem [resolvable:$true] %s50_s28 }
   0x8   :  { %56 = dma.hbm_to_vmem [thread:$0]  %s49_s24, 4096, %s51_s28, [#allocation6], %s1449_s25, %s1449_s25, %s1450_s26  }
   0x9   :  { %1442 = dma.done.wait [#allocation3], 4096  }
   0xa   :  { %1443 = vsyncadd [#allocation3], 4294963200 }
   0xb   :  { %1444 = dma.done.wait [#allocation6], 4096  }
   0xc   :  { %1445 = vsyncadd [#allocation6], 4294963200  ;;  %v1452_v0 = vmov 0   ;;  %v72_v1 = vld [vmem:[%s1615_s1] sm:$0xff]  ;;  %v1453_v4 = vmov 1   ;;  %vm904_vm0 = vcmask 15360  }
   0xd   :  { %1355 = vset.pattern.permute.xlu1 %v1452_v0  ;;  %1353 = vset.pattern.permute.xlu0 %v1452_v0  ;;  %v71_v2 = vld [vmem:[%s1614_s0] sm:$0xff]  ;;  %v986_v5 = vld [vmem:[#allocation2 + $0x70] sm:$0xf]  ;;  %v1263_v6 = vld [vmem:[#allocation2 + $0x74] sm:$0xf0]  ;;  %s1456_s23 = smov [#allocation7]  }
   0xe   :  { %205 = vperm.xlu1 %1355, %v72_v1   ;;  %177 = vperm.xlu0 %1353, %v71_v2   ;;  %v73_v3 = vld [vmem:[%s1616_s2] sm:$0xff]  ;;  %v1050_v7 = vld [vmem:[#allocation2 + $0xf0] sm:$0xf]  ;;  %v987_v8 = vor.u32 %v1263_v6, %v986_v5  ;;  %v1279_v9 = vld [vmem:[#allocation2 + $0xf4] sm:$0xf0]  ;;  %s915_s24 = sshll.u32 %s1456_s23, 4  ;;  %s916_s24 = int_to_ptr.vmem [resolvable:$true] %s915_s24 }
   0xf   :  { %v1262_v10 = vld [vmem:[#allocation2 + $0x74] sm:$0xf]  ;;  %v988_v11 = vld [vmem:[#allocation2 + $0x78] sm:$0xf0]  ;;  %v1051_v12 = vor.u32 %v1279_v9, %v1050_v7  ;;  %v978_v16 = vld [vmem:[#allocation2 + $0x60] sm:$0xf] }
  0x10   :  { %v991_v13 = vor.u32 %v1262_v10, %v988_v11  ;;  %v1278_v14 = vld [vmem:[#allocation2 + $0xf4] sm:$0xf]  ;;  %v1052_v15 = vld [vmem:[#allocation2 + $0xf8] sm:$0xf0]  ;;  %414 = vmatpush.bf16.msra.mxu0 %v987_v8  ;;  %v1261_v18 = vld [vmem:[#allocation2 + $0x64] sm:$0xf0] }
  0x11   :  { %v1055_v17 = vor.u32 %v1278_v14, %v1052_v15  ;;  %v1042_v19 = vld [vmem:[#allocation2 + $0xe0] sm:$0xf]  ;;  %v1277_v20 = vld [vmem:[#allocation2 + $0xe4] sm:$0xf0]  ;;  %432 = vmatpush.bf16.msra.mxu1 %v1051_v12  ;;  %v979_v21 = vor.u32 %v1261_v18, %v978_v16  ;;  %v1260_v23 = vld [vmem:[#allocation2 + $0x64] sm:$0xf] }
  0x12   :  { %450 = vmatpush.bf16.msra.mxu2 %v991_v13  ;;  %v1043_v22 = vor.u32 %v1277_v20, %v1042_v19  ;;  %v980_v24 = vld [vmem:[#allocation2 + $0x68] sm:$0xf0]  ;;  %v1276_v25 = vld [vmem:[#allocation2 + $0xe4] sm:$0xf]  ;;  %v970_v29 = vld [vmem:[#allocation2 + $0x50] sm:$0xf] }
  0x13   :  { %468 = vmatpush.bf16.msra.mxu3 %v1055_v17  ;;  %v983_v26 = vor.u32 %v1260_v23, %v980_v24  ;;  %v1044_v27 = vld [vmem:[#allocation2 + $0xe8] sm:$0xf0]  ;;  %v1259_v30 = vld [vmem:[#allocation2 + $0x54] sm:$0xf0]  ;;  %v1034_v31 = vld [vmem:[#allocation2 + $0xd0] sm:$0xf] }
  0x14   :  { %v1047_v28 = vor.u32 %v1276_v25, %v1044_v27  ;;  %415 = vmatpush.bf16.msra.mxu0 %v979_v21  ;;  %v971_v32 = vor.u32 %v1259_v30, %v970_v29  ;;  %v1275_v33 = vld [vmem:[#allocation2 + $0xd4] sm:$0xf0]  ;;  %v1258_v34 = vld [vmem:[#allocation2 + $0x54] sm:$0xf]  ;;  %v972_v35 = vld [vmem:[#allocation2 + $0x58] sm:$0xf0] }
  0x15   :  { %433 = vmatpush.bf16.msra.mxu1 %v1043_v22  ;;  %v1035_v36 = vor.u32 %v1275_v33, %v1034_v31  ;;  %v975_v37 = vor.u32 %v1258_v34, %v972_v35  ;;  %v1274_v38 = vld [vmem:[#allocation2 + $0xd4] sm:$0xf]  ;;  %v1036_v39 = vld [vmem:[#allocation2 + $0xd8] sm:$0xf0]  ;;  %v962_v41 = vld [vmem:[#allocation2 + $0x40] sm:$0xf] }
  0x16   :  { %220 = vperm.xlu1 %1355, %v73_v3   ;;  %1354 = vset.pattern.permute.xlu0 %v1453_v4  ;;  %v1039_v40 = vor.u32 %v1274_v38, %v1036_v39  ;;  %v1257_v42 = vld [vmem:[#allocation2 + $0x44] sm:$0xf0]  ;;  %v1026_v43 = vld [vmem:[#allocation2 + $0xc0] sm:$0xf]  ;;  %v1256_v46 = vld [vmem:[#allocation2 + $0x44] sm:$0xf] }
  0x17   :  { %190 = vperm.xlu0 %1354, %v71_v2   ;;  %451 = vmatpush.bf16.msra.mxu2 %v983_v26  ;;  %v963_v44 = vor.u32 %v1257_v42, %v962_v41  ;;  %v1273_v45 = vld [vmem:[#allocation2 + $0xc4] sm:$0xf0]  ;;  %v964_v47 = vld [vmem:[#allocation2 + $0x48] sm:$0xf0]  ;;  %v1272_v50 = vld [vmem:[#allocation2 + $0xc4] sm:$0xf] }
  0x18   :  { %469 = vmatpush.bf16.msra.mxu3 %v1047_v28  ;;  %416 = vmatpush.bf16.msra.mxu0 %v971_v32  ;;  %v1027_v48 = vor.u32 %v1273_v45, %v1026_v43  ;;  %v967_v49 = vor.u32 %v1256_v46, %v964_v47  ;;  %v1028_v51 = vld [vmem:[#allocation2 + $0xc8] sm:$0xf0]  ;;  %v954_v53 = vld [vmem:[#allocation2 + $0x30] sm:$0xf]  ;;  %v1255_v54 = vld [vmem:[#allocation2 + $0x34] sm:$0xf0] }
  0x19   :  { %434 = vmatpush.bf16.msra.mxu1 %v1035_v36  ;;  %v1031_v52 = vor.u32 %v1272_v50, %v1028_v51  ;;  %v1018_v55 = vld [vmem:[#allocation2 + $0xb0] sm:$0xf]  ;;  %v955_v56 = vor.u32 %v1255_v54, %v954_v53  ;;  %v1271_v57 = vld [vmem:[#allocation2 + $0xb4] sm:$0xf0]  ;;  %v1254_v58 = vld [vmem:[#allocation2 + $0x34] sm:$0xf] }
  0x1a   :  { %v956_v59 = vld [vmem:[#allocation2 + $0x38] sm:$0xf0]  ;;  %v1019_v60 = vor.u32 %v1271_v57, %v1018_v55  ;;  %v1270_v62 = vld [vmem:[#allocation2 + $0xb4] sm:$0xf]  ;;  %v1253_v2 = vld [vmem:[#allocation2 + $0x24] sm:$0xf0] }
  0x1b   :  { %452 = vmatpush.bf16.msra.mxu2 %v975_v37  ;;  %v959_v61 = vor.u32 %v1254_v58, %v956_v59  ;;  %v1020_v63 = vld [vmem:[#allocation2 + $0xb8] sm:$0xf0]  ;;  %v1010_v3 = vld [vmem:[#allocation2 + $0xa0] sm:$0xf]  ;;  %v1269_v4 = vld [vmem:[#allocation2 + $0xa4] sm:$0xf0] }
  0x1c   :  { %470 = vmatpush.bf16.msra.mxu3 %v1039_v40  ;;  %417 = vmatpush.bf16.msra.mxu0 %v963_v44  ;;  %v1023_v1 = vor.u32 %v1270_v62, %v1020_v63  ;;  %v1252_v6 = vld [vmem:[#allocation2 + $0x24] sm:$0xf]  ;;  %v948_v7 = vld [vmem:[#allocation2 + $0x28] sm:$0xf0]  ;;  %v1011_v9 = vor.u32 %v1269_v4, %v1010_v3  ;;  %v938_v12 = vld [vmem:[#allocation2 + $0x10] sm:$0xf] }
  0x1d   :  { %435 = vmatpush.bf16.msra.mxu1 %v1027_v48  ;;  %v1268_v8 = vld [vmem:[#allocation2 + $0xa4] sm:$0xf]  ;;  %v951_v10 = vor.u32 %v1252_v6, %v948_v7  ;;  %v1012_v11 = vld [vmem:[#allocation2 + $0xa8] sm:$0xf0]  ;;  %v1251_v13 = vld [vmem:[#allocation2 + $0x14] sm:$0xf0] }
  0x1e   :  { %v1015_v14 = vor.u32 %v1268_v8, %v1012_v11  ;;  %v1002_v15 = vld [vmem:[#allocation2 + $0x90] sm:$0xf]  ;;  %v1267_v16 = vld [vmem:[#allocation2 + $0x94] sm:$0xf0]  ;;  %v1250_v17 = vld [vmem:[#allocation2 + $0x14] sm:$0xf]  ;;  %v939_v21 = vor.u32 %v1251_v13, %v938_v12 }
  0x1f   :  { %1356 = vset.pattern.permute.xlu0 %v1452_v0  ;;  %453 = vmatpush.bf16.msra.mxu2 %v967_v49  ;;  %v946_v0 = vld [vmem:[#allocation2 + $0x20] sm:$0xf]  ;;  %v940_v18 = vld [vmem:[#allocation2 + $0x18] sm:$0xf0]  ;;  %v1266_v19 = vld [vmem:[#allocation2 + $0x94] sm:$0xf]  ;;  %v1003_v22 = vor.u32 %v1267_v16, %v1002_v15 }
  0x20   :  { %471 = vmatpush.bf16.msra.mxu3 %v1031_v52  ;;  %418 = vmatpush.bf16.msra.mxu0 %v955_v56  ;;  %v947_v5 = vor.u32 %v1253_v2, %v946_v0  ;;  %v1004_v20 = vld [vmem:[#allocation2 + $0x98] sm:$0xf0]  ;;  %v943_v23 = vor.u32 %v1250_v17, %v940_v18  ;;  %v930_v24 = vld [vmem:[#allocation2] sm:$0xf]  ;;  %v1249_v25 = vld [vmem:[#allocation2 + $0x4] sm:$0xf0] }
  0x21   :  { %436 = vmatpush.bf16.msra.mxu1 %v1019_v60  ;;  %v994_v26 = vld [vmem:[#allocation2 + $0x80] sm:$0xf]  ;;  %v1007_v27 = vor.u32 %v1266_v19, %v1004_v20  ;;  %v1265_v28 = vld [vmem:[#allocation2 + $0x84] sm:$0xf0]  ;;  %v1248_v29 = vld [vmem:[#allocation2 + $0x4] sm:$0xf]  ;;  %v931_v33 = vor.u32 %v1249_v25, %v930_v24 }
  0x22   :  { %v932_v30 = vld [vmem:[#allocation2 + $0x8] sm:$0xf0]  ;;  %v1264_v31 = vld [vmem:[#allocation2 + $0x84] sm:$0xf]  ;;  %v995_v34 = vor.u32 %v1265_v28, %v994_v26  ;;  %v171_v59 = vld [vmem:[%s1618_s4] sm:$0x3] }
  0x23   :  { %454 = vmatpush.bf16.msra.mxu2 %v959_v61  ;;  %v996_v32 = vld [vmem:[#allocation2 + $0x88] sm:$0xf0]  ;;  %v935_v35 = vor.u32 %v1248_v29, %v932_v30  ;;  %v74_v36 = vld [vmem:[%s1617_s3] sm:$0xff]  ;;  %v234_v3 = vperm.slane %v171_v59, 0  ;;  %v235_v4 = vperm.slane %v171_v59, 1  ;;  %s917_s27 = sshll.u32 %s1625_s11, 4  ;;  %s918_s27 = int_to_ptr.hbm [resolvable:$true] %s917_s27 }
  0x24   :  { %472 = vmatpush.bf16.msra.mxu3 %v1023_v1  ;;  %419 = vmatpush.bf16.msra.mxu0 %v947_v5  ;;  %v999_v37 = vor.u32 %v1264_v31, %v996_v32  ;;  %v181_v40 = vperm.slane %v74_v36, 0  ;;  %v182_v41 = vperm.slane %v74_v36, 4  ;;  %v193_v42 = vperm.slane %v74_v36, 1  ;;  %v1114_v13 = vld [vmem:[#allocation5 + $0x70] sm:$0xf] }
  0x25   :  { %437 = vmatpush.bf16.msra.mxu1 %v1011_v9  ;;  %v194_v43 = vperm.slane %v74_v36, 5  ;;  %v208_v44 = vperm.slane %v74_v36, 2  ;;  %v209_v45 = vperm.slane %v74_v36, 6  ;;  %v223_v46 = vperm.slane %v74_v36, 3  ;;  %v1294_v15 = vld [vmem:[#allocation5 + $0x74] sm:$0xf] }
  0x26   :  { %v224_v47 = vperm.slane %v74_v36, 7  ;;  %v1535_v48 = vperm.slane %v181_v40, 0  ;;  %v1537_v49 = vperm.slane %v182_v41, 0  ;;  %v1539_v50 = vperm.slane %v193_v42, 1  ;;  %v1116_v17 = vld [vmem:[#allocation5 + $0x78] sm:$0xf0] }
  0x27   :  { %455 = vmatpush.bf16.msra.mxu2 %v951_v10  ;;  %v1541_v51 = vperm.slane %v194_v43, 1  ;;  %v212_v52 = vperm.slane %v208_v44, 2  ;;  %v213_v53 = vperm.slane %v209_v45, 2  ;;  %v227_v54 = vperm.slane %v223_v46, 3  ;;  %v1106_v18 = vld [vmem:[#allocation5 + $0x60] sm:$0xf] }
  0x28   :  { %473 = vmatpush.bf16.msra.mxu3 %v1015_v14  ;;  %420 = vmatpush.bf16.msra.mxu0 %v939_v21  ;;  %v228_v55 = vperm.slane %v224_v47, 3  ;;  %v1295_v14 = vld [vmem:[#allocation5 + $0x74] sm:$0xf0]  ;;  %v1293_v19 = vld [vmem:[#allocation5 + $0x64] sm:$0xf0]  ;;  %v1119_v20 = vor.u32 %v1294_v15, %v1116_v17  ;;  %vm906_vm1 = vcmask 31744  }
  0x29   :  { %438 = vmatpush.bf16.msra.mxu1 %v1003_v22  ;;  %v1115_v16 = vor.u32 %v1295_v14, %v1114_v13  ;;  %v1292_v21 = vld [vmem:[#allocation5 + $0x64] sm:$0xf]  ;;  %v1108_v22 = vld [vmem:[#allocation5 + $0x68] sm:$0xf0]  ;;  %v1107_v24 = vor.u32 %v1293_v19, %v1106_v18  ;;  %v1180_v25 = vld [vmem:[#allocation5 + $0xf8] sm:$0xf0] }
  0x2a   :  { %v1178_v26 = vld [vmem:[#allocation5 + $0xf0] sm:$0xf]  ;;  %v1111_v28 = vor.u32 %v1292_v21, %v1108_v22  ;;  %v1291_v32 = vld [vmem:[#allocation5 + $0x54] sm:$0xf0]  ;;  %v1172_v36 = vld [vmem:[#allocation5 + $0xe8] sm:$0xf0] }
  0x2b   :  { %456 = vmatpush.bf16.msra.mxu2 %v943_v23  ;;  %v1310_v23 = vld [vmem:[#allocation5 + $0xf4] sm:$0xf]  ;;  %v1098_v31 = vld [vmem:[#allocation5 + $0x50] sm:$0xf]  ;;  %v1309_v40 = vld [vmem:[#allocation5 + $0xe4] sm:$0xf0] }
  0x2c   :  { %474 = vmatpush.bf16.msra.mxu3 %v1007_v27  ;;  %421 = vmatpush.bf16.msra.mxu0 %v931_v33  ;;  %v1311_v27 = vld [vmem:[#allocation5 + $0xf4] sm:$0xf0]  ;;  %v1183_v29 = vor.u32 %v1310_v23, %v1180_v25  ;;  %v1290_v33 = vld [vmem:[#allocation5 + $0x54] sm:$0xf]  ;;  %v1099_v43 = vor.u32 %v1291_v32, %v1098_v31  ;;  %v1154_v13 = vld [vmem:[#allocation5 + $0xc0] sm:$0xf] }
  0x2d   :  { %439 = vmatpush.bf16.msra.mxu1 %v995_v34  ;;  %v1179_v30 = vor.u32 %v1311_v27, %v1178_v26  ;;  %v1100_v34 = vld [vmem:[#allocation5 + $0x58] sm:$0xf0]  ;;  %v1305_v15 = vld [vmem:[#allocation5 + $0xc4] sm:$0xf0]  ;;  %v1074_v17 = vld [vmem:[#allocation5 + $0x20] sm:$0xf] }
  0x2e   :  { %v1103_v46 = vor.u32 %v1290_v33, %v1100_v34  ;;  %v1285_v18 = vld [vmem:[#allocation5 + $0x24] sm:$0xf0]  ;;  %v1284_v19 = vld [vmem:[#allocation5 + $0x24] sm:$0xf]  ;;  %v1076_v21 = vld [vmem:[#allocation5 + $0x28] sm:$0xf0] }
  0x2f   :  { %457 = vmatpush.bf16.msra.mxu2 %v935_v35  ;;  %v1308_v35 = vld [vmem:[#allocation5 + $0xe4] sm:$0xf]  ;;  %v1079_v22 = vor.u32 %v1284_v19, %v1076_v21  ;;  %v1302_v23 = vld [vmem:[#allocation5 + $0xb4] sm:$0xf]  ;;  %v1146_v25 = vld [vmem:[#allocation5 + $0xb0] sm:$0xf] }
  0x30   :  { %475 = vmatpush.bf16.msra.mxu3 %v999_v37  ;;  %667 = vmatpush.bf16.msrb.mxu0 %v1115_v16  ;;  %v1155_v16 = vor.u32 %v1305_v15, %v1154_v13  ;;  %v1303_v27 = vld [vmem:[#allocation5 + $0xb4] sm:$0xf0]  ;;  %v1282_v31 = vld [vmem:[#allocation5 + $0x14] sm:$0xf]  ;;  %v1068_v33 = vld [vmem:[#allocation5 + $0x18] sm:$0xf0] }
  0x31   :  { %685 = vmatpush.bf16.msrb.mxu1 %v1179_v30  ;;  %v1283_v30 = vld [vmem:[#allocation5 + $0x14] sm:$0xf0]  ;;  %v1071_v34 = vor.u32 %v1282_v31, %v1068_v33  ;;  %vm908_vm2 = vcmask 48128  }
  0x33   :  { %703 = vmatpush.bf16.msrb.mxu2 %v1119_v20  ;;  %v1075_v20 = vor.u32 %v1285_v18, %v1074_v17 }
  0x34   :  { %721 = vmatpush.bf16.msrb.mxu3 %v1183_v29  ;;  %668 = vmatpush.bf16.msrb.mxu0 %v1107_v24  ;;  %v1148_v24 = vld [vmem:[#allocation5 + $0xb8] sm:$0xf0]  ;;  %v1066_v29 = vld [vmem:[#allocation5 + $0x10] sm:$0xf] }
  0x35   :  { %v1151_v26 = vor.u32 %v1302_v23, %v1148_v24  ;;  %v1067_v32 = vor.u32 %v1283_v30, %v1066_v29 }
  0x37   :  { %704 = vmatpush.bf16.msrb.mxu2 %v1111_v28  ;;  %v1147_v28 = vor.u32 %v1303_v27, %v1146_v25 }
  0x38   :  { %669 = vmatpush.bf16.msrb.mxu0 %v1099_v43  ;;  %v1280_v43 = vld [vmem:[#allocation5 + $0x4] sm:$0xf] }
  0x3b   :  { %705 = vmatpush.bf16.msrb.mxu2 %v1103_v46 }
  0x80   :  { %v178_v38 = vpop.permute.xlu0 %177  ;;  %v206_v39 = vpop.permute.xlu1 %205 }
  0x81   :  { %v187_v57 = vmul.f32 %v1535_v48, %v178_v38  ;;  %v188_v58 = vmul.f32 %v1537_v49, %v178_v38  ;;  %v214_v63 = vmul.f32 %v212_v52, %v206_v39  ;;  %v215_v0 = vmul.f32 %v213_v53, %v206_v39  ;;  %v1170_v39 = vld [vmem:[#allocation5 + $0xe0] sm:$0xf] }
  0x82   :  { %v1175_v38 = vor.u32 %v1308_v35, %v1172_v36  ;;  %v1171_v44 = vor.u32 %v1309_v40, %v1170_v39  ;;  %v1300_v35 = vld [vmem:[#allocation5 + $0xa4] sm:$0xf]  ;;  %v1140_v36 = vld [vmem:[#allocation5 + $0xa8] sm:$0xf0]  ;;  %v1301_v39 = vld [vmem:[#allocation5 + $0xa4] sm:$0xf0] }
  0x84   :  { %722 = vmatpush.bf16.msrb.mxu3 %v1175_v38  ;;  %686 = vmatpush.bf16.msrb.mxu1 %v1171_v44  ;;  %v1143_v38 = vor.u32 %v1300_v35, %v1140_v36 }
  0x88   :  { %v221_v62 = vpop.permute.xlu1 %220 }
  0x89   :  { %v191_v56 = vpop.permute.xlu0 %190  ;;  %v229_v5 = vmul.f32 %v227_v54, %v221_v62  ;;  %v230_v6 = vmul.f32 %v228_v55, %v221_v62 }
  0x8a   :  { %v199_v60 = vmul.f32 %v1539_v50, %v191_v56  ;;  %v200_v61 = vmul.f32 %v1541_v51, %v191_v56 }
  0x8c   :  { %v201_v1 = vadd.f32 %v199_v60, %v187_v57  ;;  %v202_v2 = vadd.f32 %v200_v61, %v188_v58  ;;  %v1289_v61 = vld [vmem:[#allocation5 + $0x44] sm:$0xf0] }
  0x8e   :  { %v216_v7 = vadd.f32 %v214_v63, %v201_v1  ;;  %v217_v8 = vadd.f32 %v215_v0, %v202_v2  ;;  %v1092_v63 = vld [vmem:[#allocation5 + $0x48] sm:$0xf0]  ;;  %v1306_v1 = vld [vmem:[#allocation5 + $0xd4] sm:$0xf]  ;;  %v1164_v2 = vld [vmem:[#allocation5 + $0xd8] sm:$0xf0] }
  0x90   :  { %v231_v9 = vadd.f32 %v229_v5, %v216_v7  ;;  %v232_v10 = vadd.f32 %v230_v6, %v217_v8  ;;  %v1082_v5 = vld [vmem:[#allocation5 + $0x30] sm:$0xf]  ;;  %v1287_v6 = vld [vmem:[#allocation5 + $0x34] sm:$0xf0]  ;;  %v1286_v7 = vld [vmem:[#allocation5 + $0x34] sm:$0xf] }
  0x91   :  { %v1083_v8 = vor.u32 %v1287_v6, %v1082_v5 }
  0x92   :  { %v238_v11 = vadd.f32 %v234_v3, %v231_v9  ;;  %v239_v12 = vadd.f32 %v235_v4, %v232_v10  ;;  %v1162_v3 = vld [vmem:[#allocation5 + $0xd0] sm:$0xf]  ;;  %v1167_v4 = vor.u32 %v1306_v1, %v1164_v2  ;;  %v1084_v9 = vld [vmem:[#allocation5 + $0x38] sm:$0xf0] }
  0x93   :  { %v1087_v10 = vor.u32 %v1286_v7, %v1084_v9 }
  0x94   :  { %1358 = vtanh.f32 %v238_v11  ;;  %723 = vmatpush.bf16.msrb.mxu3 %v1167_v4  ;;  %v1304_v11 = vld [vmem:[#allocation5 + $0xc4] sm:$0xf] }
  0x95   :  { %1360 = vtanh.f32 %v239_v12  ;;  %v1156_v12 = vld [vmem:[#allocation5 + $0xc8] sm:$0xf0] }
  0x96   :  { %v1159_v14 = vor.u32 %v1304_v11, %v1156_v12  ;;  %v1318_v11 = vld [vmem:[%s1623_s9 + $0x30] sm:$0xff] }
  0x98   :  { %724 = vmatpush.bf16.msrb.mxu3 %v1159_v14 }
  0x9a   :  { %v1359_v37 = vpop.eup %1358 }
  0x9b   :  { %v1361_v41 = vpop.eup %1360  ;;  %v242_v42 = vmul.f32 %v1359_v37, %v1359_v37 }
  0x9c   :  { %v243_v45 = vmul.f32 %v1361_v41, %v1361_v41  ;;  %725 = vmatpush.bf16.msrb.mxu3 %v1151_v26 }
  0x9d   :  { %v244_v47 = vsub.f32 1.0, %v242_v42  ;;  %v1281_v42 = vld [vmem:[#allocation5 + $0x4] sm:$0xf0] }
  0x9e   :  { %v245_v52 = vsub.f32 1.0, %v243_v45  ;;  %v1060_v45 = vld [vmem:[#allocation5 + $0x8] sm:$0xf0] }
  0x9f   :  { %v246_v53 = vmul.f32 %v244_v47, %v1535_v48  ;;  %v248_v57 = vmul.f32 %v244_v47, %v1539_v50  ;;  %v1090_v48 = vld [vmem:[#allocation5 + $0x40] sm:$0xf]  ;;  %v1307_v50 = vld [vmem:[#allocation5 + $0xd4] sm:$0xf0]  ;;  %v1063_v46 = vor.u32 %v1280_v43, %v1060_v45  ;;  %v1298_v47 = vld [vmem:[#allocation5 + $0x94] sm:$0xf] }
  0xa0   :  { %v247_v54 = vmul.f32 %v245_v52, %v1537_v49  ;;  %v249_v58 = vmul.f32 %v245_v52, %v1541_v51  ;;  %v1288_v49 = vld [vmem:[#allocation5 + $0x44] sm:$0xf]  ;;  %v1091_v62 = vor.u32 %v1289_v61, %v1090_v48  ;;  %v1163_v51 = vor.u32 %v1307_v50, %v1162_v3  ;;  %726 = vmatpush.bf16.msrb.mxu3 %v1143_v38  ;;  %v1132_v52 = vld [vmem:[#allocation5 + $0x98] sm:$0xf0]  ;;  %v1297_v48 = vld [vmem:[#allocation5 + $0x84] sm:$0xf0] }
  0xa1   :  { %v250_v55 = vpack.c.bf16 %v246_v53, %v1359_v37  ;;  %v252_v59 = vpack.c.bf16 %v248_v57, %v248_v57  ;;  %v1095_v0 = vor.u32 %v1288_v49, %v1092_v63  ;;  %v1138_v37 = vld [vmem:[#allocation5 + $0xa0] sm:$0xf]  ;;  %v1130_v53 = vld [vmem:[#allocation5 + $0x90] sm:$0xf]  ;;  %v1296_v57 = vld [vmem:[#allocation5 + $0x84] sm:$0xf] }
  0xa2   :  { %v251_v56 = vpack.c.bf16 %v247_v54, %v1361_v41  ;;  %v253_v60 = vpack.c.bf16 %v249_v58, %v249_v58  ;;  %670 = vmatpush.bf16.msrb.mxu0 %v1091_v62  ;;  %687 = vmatpush.bf16.msrb.mxu1 %v1163_v51  ;;  %v1139_v40 = vor.u32 %v1301_v39, %v1138_v37  ;;  %v1058_v41 = vld [vmem:[#allocation5] sm:$0xf]  ;;  %v1124_v58 = vld [vmem:[#allocation5 + $0x88] sm:$0xf0]  ;;  %v1327_v38 = vld [vmem:[%s1623_s9 + $0x78] sm:$0xff] }
  0xa3   :  { %422 = vmatmul.bf16.vlgmr.msra.gmra.mxu0 %v250_v55  ;;  %458 = vmatmul.bf16.vlgmr.msra.gmra.mxu2 %v250_v55  ;;  %v1059_v44 = vor.u32 %v1281_v42, %v1058_v41  ;;  %v1135_v54 = vor.u32 %v1298_v47, %v1132_v52  ;;  %v1299_v55 = vld [vmem:[#allocation5 + $0x94] sm:$0xf0]  ;;  %v172_v49 = vld [vmem:[%s1620_s6] sm:$0x3]  ;;  %v1317_v39 = vld [vmem:[%s1623_s9 + $0x28] sm:$0xff] }
  0xa4   :  { %440 = vmatmul.bf16.vlgmr.msra.gmra.mxu1 %v251_v56  ;;  %476 = vmatmul.bf16.vlgmr.msra.gmra.mxu3 %v251_v56  ;;  %v1131_v56 = vor.u32 %v1299_v55, %v1130_v53  ;;  %v487_v63 = vperm.slane %v172_v49, 0  ;;  %v488_v4 = vperm.slane %v172_v49, 1  ;;  %v1316_v41 = vld [vmem:[%s1623_s9 + $0x20] sm:$0xff]  ;;  %v1325_v42 = vld [vmem:[%s1623_s9 + $0x68] sm:$0xff]  ;;  %v1315_v43 = vld [vmem:[%s1623_s9 + $0x18] sm:$0xff] }
  0xa5   :  { %706 = vmatpush.bf16.msrb.mxu2 %v1095_v0  ;;  %727 = vmatpush.bf16.msrb.mxu3 %v1135_v54  ;;  %v1314_v45 = vld [vmem:[%s1623_s9 + $0x10] sm:$0xff]  ;;  %v1313_v47 = vld [vmem:[%s1623_s9 + $0x8] sm:$0xff]  ;;  %v1312_v53 = vld [vmem:[%s1623_s9] sm:$0xff] }
  0xa6   :  { %671 = vmatpush.bf16.msrb.mxu0 %v1083_v8  ;;  %688 = vmatpush.bf16.msrb.mxu1 %v1155_v16  ;;  %v1319_v8 = vld [vmem:[%s1623_s9 + $0x38] sm:$0xff]  ;;  %v1322_v52 = vld [vmem:[%s1623_s9 + $0x50] sm:$0xff]  ;;  %v1321_v54 = vld [vmem:[%s1623_s9 + $0x48] sm:$0xff] }
  0xa7   :  { %v1320_v55 = vld [vmem:[%s1623_s9 + $0x40] sm:$0xff] }
  0xa9   :  { %707 = vmatpush.bf16.msrb.mxu2 %v1087_v10 }
  0xaa   :  { %672 = vmatpush.bf16.msrb.mxu0 %v1075_v20  ;;  %689 = vmatpush.bf16.msrb.mxu1 %v1147_v28 }
  0xad   :  { %708 = vmatpush.bf16.msrb.mxu2 %v1079_v22 }
  0xae   :  { %673 = vmatpush.bf16.msrb.mxu0 %v1067_v32  ;;  %690 = vmatpush.bf16.msrb.mxu1 %v1139_v40  ;;  %v1326_v40 = vld [vmem:[%s1623_s9 + $0x70] sm:$0xff] }
  0xb1   :  { %709 = vmatpush.bf16.msrb.mxu2 %v1071_v34 }
  0xb2   :  { %674 = vmatpush.bf16.msrb.mxu0 %v1059_v44  ;;  %691 = vmatpush.bf16.msrb.mxu1 %v1131_v56  ;;  %v1324_v44 = vld [vmem:[%s1623_s9 + $0x60] sm:$0xff] }
  0xb3   :  { %427 = vmatmul.bf16.gmra.mxu0 %v252_v59  ;;  %463 = vmatmul.bf16.gmra.mxu2 %v252_v59  ;;  %v1122_v59 = vld [vmem:[#allocation5 + $0x80] sm:$0xf] }
  0xb4   :  { %445 = vmatmul.bf16.gmra.mxu1 %v253_v60  ;;  %481 = vmatmul.bf16.gmra.mxu3 %v253_v60  ;;  %v1127_v60 = vor.u32 %v1296_v57, %v1124_v58  ;;  %v1123_v61 = vor.u32 %v1297_v48, %v1122_v59  ;;  %v173_v57 = vld [vmem:[%s1622_s8] sm:$0x3]  ;;  %s1454_s8 = smov 2  }
  0xb5   :  { %710 = vmatpush.bf16.msrb.mxu2 %v1063_v46  ;;  %v1323_v46 = vld [vmem:[%s1623_s9 + $0x58] sm:$0xff]  ;;  %v740_v58 = vperm.slane %v173_v57, 0  ;;  %s1455_s9 = smov 4  }
  0xb6   :  { %728 = vmatpush.bf16.msrb.mxu3 %v1127_v60  ;;  %692 = vmatpush.bf16.msrb.mxu1 %v1123_v61 }
  0xb7   :  { %856 = vmatpush.bf16.msra.mxu0 %v1319_v8 }
  0xb9   :  { %1328 = vmatpush.bf16.msra.mxu2 %v1319_v8 }
  0xba   :  { %874 = vmatpush.bf16.msra.mxu1 %v1327_v38  ;;  %1336 = vmatpush.bf16.msra.mxu3 %v1327_v38 }
  0xbb   :  { %857 = vmatpush.bf16.msra.mxu0 %v1318_v11 }
  0xbd   :  { %1329 = vmatpush.bf16.msra.mxu2 %v1318_v11 }
  0xbe   :  { %875 = vmatpush.bf16.msra.mxu1 %v1326_v40  ;;  %1337 = vmatpush.bf16.msra.mxu3 %v1326_v40 }
  0xbf   :  { %858 = vmatpush.bf16.msra.mxu0 %v1317_v39 }
  0xc1   :  { %1330 = vmatpush.bf16.msra.mxu2 %v1317_v39 }
  0xc2   :  { %876 = vmatpush.bf16.msra.mxu1 %v1325_v42  ;;  %1338 = vmatpush.bf16.msra.mxu3 %v1325_v42 }
  0xc3   :  { %859 = vmatpush.bf16.msra.mxu0 %v1316_v41 }
  0xc5   :  { %1331 = vmatpush.bf16.msra.mxu2 %v1316_v41  ;;  %v1357_v41 = vld [vmem:[%s1624_s10] ss:$0 sm:$0xff] }
  0xc6   :  { %877 = vmatpush.bf16.msra.mxu1 %v1324_v44  ;;  %1339 = vmatpush.bf16.msra.mxu3 %v1324_v44 }
  0xc7   :  { %860 = vmatpush.bf16.msra.mxu0 %v1315_v43 }
  0xc9   :  { %1332 = vmatpush.bf16.msra.mxu2 %v1315_v43 }
  0xca   :  { %878 = vmatpush.bf16.msra.mxu1 %v1323_v46  ;;  %1340 = vmatpush.bf16.msra.mxu3 %v1323_v46 }
  0xcb   :  { %861 = vmatpush.bf16.msra.mxu0 %v1314_v45 }
  0xcd   :  { %1333 = vmatpush.bf16.msra.mxu2 %v1314_v45 }
  0xce   :  { %879 = vmatpush.bf16.msra.mxu1 %v1322_v52  ;;  %1341 = vmatpush.bf16.msra.mxu3 %v1322_v52 }
  0xcf   :  { %862 = vmatpush.bf16.msra.mxu0 %v1313_v47 }
  0xd1   :  { %1334 = vmatpush.bf16.msra.mxu2 %v1313_v47 }
  0xd2   :  { %880 = vmatpush.bf16.msra.mxu1 %v1321_v54  ;;  %1342 = vmatpush.bf16.msra.mxu3 %v1321_v54 }
  0xd3   :  { %863 = vmatpush.bf16.msra.mxu0 %v1312_v53 }
  0xd5   :  { %1335 = vmatpush.bf16.msra.mxu2 %v1312_v53 }
  0xd6   :  { %881 = vmatpush.bf16.msra.mxu1 %v1320_v55  ;;  %1343 = vmatpush.bf16.msra.mxu3 %v1320_v55 }
 0x120   :  { %v423_v62 = vpop.f32.mrf.mxu0 }
 0x121   :  { %v441_v0 = vpop.f32.mrf.mxu1 }
 0x122   :  { %v442_v1 = vadd.f32 %v441_v0, %v423_v62  ;;  %v741_v62 = vperm.slane %v173_v57, 1 }
 0x124   :  { %v491_v2 = vadd.f32 %v487_v63, %v442_v1 }
 0x126   :  { %1362 = vtanh.f32 %v491_v2  ;;  %v459_v3 = vpop.f32.mrf.mxu2 }
 0x127   :  { %v477_v50 = vpop.f32.mrf.mxu3 }
 0x128   :  { %v478_v51 = vadd.f32 %v477_v50, %v459_v3  ;;  %v425_v5 = vpop.f32.mrf.mxu0 }
 0x129   :  { %v443_v6 = vpop.f32.mrf.mxu1 }
 0x12a   :  { %v492_v7 = vadd.f32 %v488_v4, %v478_v51  ;;  %v444_v13 = vadd.f32 %v443_v6, %v425_v5 }
 0x12c   :  { %v1363_v9 = vpop.eup %1362  ;;  %1364 = vtanh.f32 %v492_v7 }
 0x12d   :  { %v495_v10 = vmul.f32 %v1363_v9, %v1363_v9 }
 0x12e   :  { %v461_v12 = vpop.f32.mrf.mxu2 }
 0x12f   :  { %v497_v14 = vsub.f32 1.0, %v495_v10  ;;  %v479_v15 = vpop.f32.mrf.mxu3 }
 0x130   :  { %v428_v16 = vpop.f32.mrf.mxu0  ;;  %v480_v22 = vadd.f32 %v479_v15, %v461_v12 }
 0x131   :  { %v499_v17 = vmul.f32 %v497_v14, %v444_v13  ;;  %v446_v18 = vpop.f32.mrf.mxu1 }
 0x132   :  { %v1365_v19 = vpop.eup %1364  ;;  %v447_v30 = vadd.f32 %v446_v18, %v428_v16 }
 0x133   :  { %v496_v20 = vmul.f32 %v1365_v19, %v1365_v19  ;;  %v503_v21 = vpack.c.bf16 %v499_v17, %v1363_v9 }
 0x134   :  { %v501_v33 = vmul.f32 %v497_v14, %v447_v30 }
 0x135   :  { %v498_v23 = vsub.f32 1.0, %v496_v20  ;;  %675 = vmatmul.bf16.vlgmr.msrb.gmra.mxu0 %v503_v21  ;;  %711 = vmatmul.bf16.vlgmr.msrb.gmra.mxu2 %v503_v21 }
 0x136   :  { %v464_v24 = vpop.f32.mrf.mxu2  ;;  %v505_v35 = vpack.c.bf16 %v501_v33, %v501_v33 }
 0x137   :  { %v500_v25 = vmul.f32 %v498_v23, %v480_v22  ;;  %v482_v26 = vpop.f32.mrf.mxu3 }
 0x138   :  { %v430_v27 = vpop.f32.mrf.mxu0  ;;  %v483_v34 = vadd.f32 %v482_v26, %v464_v24 }
 0x139   :  { %v448_v28 = vpop.f32.mrf.mxu1  ;;  %v504_v29 = vpack.c.bf16 %v500_v25, %v1365_v19 }
 0x13a   :  { %v502_v36 = vmul.f32 %v498_v23, %v483_v34 }
 0x13b   :  { %693 = vmatmul.bf16.vlgmr.msrb.gmra.mxu1 %v504_v29  ;;  %729 = vmatmul.bf16.vlgmr.msrb.gmra.mxu3 %v504_v29 }
 0x13c   :  { %v506_v37 = vpack.c.bf16 %v502_v36, %v502_v36 }
 0x13e   :  { %v466_v31 = vpop.f32.mrf.mxu2 }
 0x13f   :  { %v484_v32 = vpop.f32.mrf.mxu3 }
 0x145   :  { %680 = vmatmul.bf16.gmra.mxu0 %v505_v35  ;;  %716 = vmatmul.bf16.gmra.mxu2 %v505_v35 }
 0x14b   :  { %698 = vmatmul.bf16.gmra.mxu1 %v506_v37  ;;  %734 = vmatmul.bf16.gmra.mxu3 %v506_v37 }
 0x1b2   :  { %v676_v56 = vpop.f32.mrf.mxu0 }
 0x1b8   :  { %v694_v59 = vpop.f32.mrf.mxu1  ;;  %v712_v60 = vpop.f32.mrf.mxu2 }
 0x1b9   :  { %v695_v48 = vadd.f32 %v694_v59, %v676_v56 }
 0x1ba   :  { %v678_v61 = vpop.f32.mrf.mxu0 }
 0x1bb   :  { %v744_v49 = vadd.f32 %v740_v58, %v695_v48 }
 0x1bd   :  { %1366 = vtanh.f32 %v744_v49 }
 0x1be   :  { %v730_v63 = vpop.f32.mrf.mxu3 }
 0x1bf   :  { %v731_v0 = vadd.f32 %v730_v63, %v712_v60 }
 0x1c0   :  { %v696_v1 = vpop.f32.mrf.mxu1  ;;  %v714_v2 = vpop.f32.mrf.mxu2 }
 0x1c1   :  { %v745_v3 = vadd.f32 %v741_v62, %v731_v0  ;;  %v697_v5 = vadd.f32 %v696_v1, %v678_v61 }
 0x1c2   :  { %v681_v4 = vpop.f32.mrf.mxu0 }
 0x1c3   :  { %v1367_v50 = vpop.eup %1366  ;;  %1368 = vtanh.f32 %v745_v3 }
 0x1c4   :  { %v748_v51 = vmul.f32 %v1367_v50, %v1367_v50 }
 0x1c6   :  { %v750_v6 = vsub.f32 1.0, %v748_v51  ;;  %v732_v7 = vpop.f32.mrf.mxu3 }
 0x1c7   :  { %v733_v17 = vadd.f32 %v732_v7, %v714_v2 }
 0x1c8   :  { %v752_v8 = vmul.f32 %v750_v6, %v697_v5  ;;  %v699_v9 = vpop.f32.mrf.mxu1  ;;  %v717_v10 = vpop.f32.mrf.mxu2 }
 0x1c9   :  { %v1369_v11 = vpop.eup %1368  ;;  %v700_v12 = vadd.f32 %v699_v9, %v681_v4 }
 0x1ca   :  { %v756_v13 = vpack.c.bf16 %v752_v8, %v1367_v50  ;;  %v749_v14 = vmul.f32 %v1369_v11, %v1369_v11  ;;  %v683_v15 = vpop.f32.mrf.mxu0 }
 0x1cb   :  { %v754_v16 = vmul.f32 %v750_v6, %v700_v12 }
 0x1cc   :  { %v751_v18 = vsub.f32 1.0, %v749_v14  ;;  %864 = vmatmul.bf16.vlgmr.msra.gmra.mxu0 %v756_v13 }
 0x1cd   :  { %v758_v19 = vpack.c.bf16 %v754_v16, %v754_v16 }
 0x1ce   :  { %v753_v20 = vmul.f32 %v751_v18, %v733_v17  ;;  %v735_v21 = vpop.f32.mrf.mxu3 }
 0x1cf   :  { %v736_v22 = vadd.f32 %v735_v21, %v717_v10  ;;  %869 = vmatmul.bf16.vlgmr.msra.gmra.mxu2 %v758_v19 }
 0x1d0   :  { %v757_v23 = vpack.c.bf16 %v753_v20, %v1369_v11  ;;  %v701_v24 = vpop.f32.mrf.mxu1  ;;  %v719_v25 = vpop.f32.mrf.mxu2 }
 0x1d1   :  { %v755_v26 = vmul.f32 %v751_v18, %v736_v22 }
 0x1d2   :  { %882 = vmatmul.bf16.vlgmr.msra.gmra.mxu1 %v757_v23 }
 0x1d3   :  { %v759_v27 = vpack.c.bf16 %v755_v26, %v755_v26 }
 0x1d5   :  { %887 = vmatmul.bf16.vlgmr.msra.gmra.mxu3 %v759_v27 }
 0x1d6   :  { %v737_v28 = vpop.f32.mrf.mxu3 }
 0x249   :  { %v865_v29 = vpop.f32.mrf.mxu0 }
 0x24f   :  { %v883_v30 = vpop.f32.mrf.mxu1 }
 0x250   :  { %v884_v31 = vadd.f32 %v883_v30, %v865_v29 }
 0x251   :  { %v867_v33 = vpop.f32.mrf.mxu0 }
 0x252   :  { %v870_v32 = vpop.f32.mrf.mxu2  ;;  %v895_v42 = vadd.f32 %v1357_v41, %v884_v31 }
 0x257   :  { %v885_v34 = vpop.f32.mrf.mxu1 }
 0x258   :  { %v886_v35 = vadd.f32 %v885_v34, %v867_v33  ;;  %v888_v36 = vpop.f32.mrf.mxu3 }
 0x259   :  { %v889_v38 = vadd.f32 %v888_v36, %v870_v32 }
 0x25a   :  { %v872_v37 = vpop.f32.mrf.mxu2  ;;  %897 = vrot.lane.b32.xlu2 %v886_v35, %s1454_s8 }
 0x260   :  { %v890_v39 = vpop.f32.mrf.mxu3 }
 0x262   :  { %901 = vrot.lane.b32.xlu2 %v889_v38, %s1455_s9 }
 0x2b4   :  { %v898_v40 = vpop.permute.xlu2 %897 }
 0x2b5   :  { %v905_v43 = vsel %vm904_vm0, %v895_v42, %v898_v40 }
 0x2bc   :  { %v902_v44 = vpop.permute.xlu2 %901 }
 0x2bd   :  { %v907_v45 = vsel %vm906_vm1, %v905_v43, %v902_v44 }
 0x2be   :  { %909 = vst.msk [vmem:[#allocation7] sm:$0xff] %vm908_vm2, %v907_v45 }
 0x2bf   :  { %920 = dma.vmem_to_hbm [thread:$0]  %s916_s24, 128, %s918_s27, [#allocation4]  }
 0x2c0   :  { %1446 = dma.done.wait [#allocation4], 128  }
 0x2c1   :  { %1447 = vsyncadd [#allocation4], 4294967168 }
 0x2c2   :  { %925 = vsyncpa [#allocation3], 1 }
 0x2c3   :  { %926 = vsyncpa [#allocation6], 1 }
 0x2c4   :  { %927 = vsyncpa [#allocation4], 1 }

</bundles_post_ra>
